<compile_context>
chip_gen: v5e
topology: v5e:2x2
jax: 0.10.0
libtpu: 0.0.40
codegen_flags: <defaults>
</compile_context>

<pallas_src>
from functools import partial

import jax
import jax.numpy as jnp
import numpy as np
from jax.experimental import pallas as pl
from jax.experimental.pallas import tpu as pltpu


def _attention_kernel(len_ref, o_ref, c_ref, wm_ref, wo_ref, b_ref,
                      res_ref, attn_ref):
    # len_ref : SMEM (1,) int32   valid context rows (<= Lk)
    # o_ref   : (L_out, D)        decoder output features
    # c_ref   : (Lk, D)           encoder context (rows >= len are zero pad)
    # wm_ref  : (D, D)            linear_out weight for `mix`  (pre-transposed)
    # wo_ref  : (D, D)            linear_out weight for output (pre-transposed)
    # b_ref   : (1, D)            bias
    # res_ref : (L_out, D)        attended output
    # attn_ref: (L_out, Lk)       attention weights
    o = o_ref[...].astype(jnp.float32)
    c = c_ref[...].astype(jnp.float32)

    # scores = output @ context^T : contract the last dims of both operands,
    # no explicit transposed copy of the context tile is built.
    scores = jax.lax.dot_general(
        o, c,
        dimension_numbers=(((1,), (1,)), ((), ())),
        preferred_element_type=jnp.float32)                     # (L_out, Lk)

    # Mask key positions >= valid length (no-op when the context is unpadded,
    # exact softmax when the caller buckets/pads the context rows).
    l_in = len_ref[0]
    col = jax.lax.broadcasted_iota(jnp.int32, scores.shape, 1)
    valid = col < l_in

    m = jnp.max(jnp.where(valid, scores, -jnp.inf), axis=-1, keepdims=True)
    e = jnp.where(valid, jnp.exp(scores - m), 0.0)
    s = jnp.sum(e, axis=-1, keepdims=True)

    # EUP approximate reciprocal + one Newton-Raphson step (~f32 accuracy).
    r = pl.reciprocal(s, approx=True)
    r = r * (2.0 - s * r)
    attn = e * r
    attn_ref[...] = attn.astype(attn_ref.dtype)

    # mix = attn @ context (zero-padded context rows contribute nothing).
    mix = jnp.dot(attn, c, preferred_element_type=jnp.float32)  # (L_out, D)

    # tanh(linear_out(cat([mix, output], -1)))
    #   == tanh(mix @ Wm^T + output @ Wo^T + b)
    # computed as two accumulated D x D MXU passes -- no concat, no K padding.
    y = jnp.dot(mix, wm_ref[...].astype(jnp.float32),
                preferred_element_type=jnp.float32)
    y = y + jnp.dot(o, wo_ref[...].astype(jnp.float32),
                    preferred_element_type=jnp.float32)
    y = y + b_ref[...].astype(jnp.float32)
    res_ref[...] = jnp.tanh(y).astype(res_ref.dtype)


def prepare_weights(W, b):
    """One-time split/transpose of nn.Linear(dim*2, dim) params (hoisted out
    of the call path).  W: (D, 2D); W[:, :D] multiplies `mix`, W[:, D:]
    multiplies the decoder output.  No padding needed."""
    D = W.shape[0]
    w_mix_t = jnp.asarray(W[:, :D].T)          # (D, D)
    w_out_t = jnp.asarray(W[:, D:].T)          # (D, D)
    b_row = jnp.asarray(b).reshape(1, D)       # (1, D)
    return w_mix_t, w_out_t, b_row


@partial(jax.jit, static_argnames=("l_in_bucket",))
def attention_forward(output, context, w_mix_t, w_out_t, b_row,
                      l_in_bucket=None):
    """output: (1, L_out, D); context: (L_in, D); params from prepare_weights.

    l_in_bucket (static, optional): pad the context rows up to this bucket so
    the same compiled Mosaic kernel is reused across variable L_in; the true
    length is passed to the kernel as an SMEM scalar for exact masking.
    """
    B, L_out, D = output.shape
    assert B == 1, "module semantics only hold for batch_size == 1"
    L_in = context.shape[0]
    Lk = L_in if l_in_bucket is None else int(l_in_bucket)
    assert Lk >= L_in

    out2d = output[0]                                   # (L_out, D), free squeeze
    if Lk == L_in:
        ctx = context                                   # common path: no padding op
    else:
        ctx = jnp.zeros((Lk, D), context.dtype).at[:L_in].set(context)
    l_in_arr = jnp.full((1,), L_in, jnp.int32)

    res2d, attn2d = pl.pallas_call(
        _attention_kernel,
        out_shape=(jax.ShapeDtypeStruct((L_out, D), output.dtype),
                   jax.ShapeDtypeStruct((L_out, Lk), output.dtype)),
        in_specs=[
            pl.BlockSpec(memory_space=pltpu.MemorySpace.SMEM),   # l_in scalar
            pl.BlockSpec(memory_space=pltpu.MemorySpace.VMEM),   # output
            pl.BlockSpec(memory_space=pltpu.MemorySpace.VMEM),   # context
            pl.BlockSpec(memory_space=pltpu.MemorySpace.VMEM),   # w_mix_t
            pl.BlockSpec(memory_space=pltpu.MemorySpace.VMEM),   # w_out_t
            pl.BlockSpec(memory_space=pltpu.MemorySpace.VMEM),   # bias
        ],
        out_specs=(pl.BlockSpec(memory_space=pltpu.MemorySpace.VMEM),
                   pl.BlockSpec(memory_space=pltpu.MemorySpace.VMEM)),
        # No grid: single VMEM-resident tile; grid steps would add pure overhead.
    )(l_in_arr, out2d, ctx, w_mix_t, w_out_t, b_row)

    res = res2d[None]                                    # (1, L_out, D)
    if Lk == L_in:
        attn = attn2d[None]                              # (1, L_out, L_in)
    else:
        attn = attn2d[None, :, :L_in]                    # bucketed path only
    return res, attn


def _reference(output, context, W, b):
    # pure-JAX mirror of the PyTorch forward (batch = 1, 2-D context)
    B, L_out, D = output.shape
    ctx3 = context.reshape(1, -1, context.shape[1])               # (1, L_in, D)
    scores = jnp.einsum("bqd,bkd->bqk", output, ctx3)             # (1, L_out, L_in)
    attn = jax.nn.softmax(scores, axis=-1)
    mix = jnp.einsum("bqk,bkd->bqd", attn, ctx3)                  # (1, L_out, D)
    comb = jnp.concatenate([mix, output], axis=-1)                # (1, L_out, 2D)
    res = jnp.tanh(comb.reshape(-1, 2 * D) @ W.T + b).reshape(1, -1, D)
    return res, attn


if __name__ == "__main__":
    dim = 32
    L_out, L_in = 8, 16

    key = jax.random.PRNGKey(0)
    k1, k2, k3, k4, k5 = jax.random.split(key, 5)

    output = jax.random.normal(k1, (1, L_out, dim), dtype=jnp.float32)
    context = jax.random.normal(k2, (L_in, dim), dtype=jnp.float32)

    # nn.Linear(dim*2, dim): weight (dim, 2*dim), bias (dim,) ~ U(-1/sqrt(2*dim), +)
    bound = 1.0 / np.sqrt(2 * dim)
    W = jax.random.uniform(k3, (dim, 2 * dim), jnp.float32, -bound, bound)
    b = jax.random.uniform(k4, (dim,), jnp.float32, -bound, bound)

    # TODO(synk): self.mask / set_mask (optional masked_fill with -inf) and
    # PackedSequence inputs are not modeled; only the dense batch==1 path is.
    w_mix_t, w_out_t, b_row = prepare_weights(W, b)   # hoisted out of the call path

    # --- exact-shape path (no padding anywhere) ---
    res, attn = attention_forward(output, context, w_mix_t, w_out_t, b_row)
    jax.block_until_ready((res, attn))
    res_ref, attn_ref = _reference(output, context, W, b)
    np.testing.assert_allclose(np.asarray(res), np.asarray(res_ref), rtol=1e-5, atol=1e-5)
    np.testing.assert_allclose(np.asarray(attn), np.asarray(attn_ref), rtol=1e-5, atol=1e-5)

    # --- bucketed path: 13-token context through the 16-row bucket kernel ---
    # (same Mosaic kernel as above; the SMEM length scalar masks padded keys)
    L_in2 = 13
    context2 = jax.random.normal(k5, (L_in2, dim), dtype=jnp.float32)
    res2, attn2 = attention_forward(output, context2, w_mix_t, w_out_t, b_row,
                                    l_in_bucket=16)
    jax.block_until_ready((res2, attn2))
    res2_ref, attn2_ref = _reference(output, context2, W, b)
    np.testing.assert_allclose(np.asarray(res2), np.asarray(res2_ref), rtol=1e-5, atol=1e-5)
    np.testing.assert_allclose(np.asarray(attn2), np.asarray(attn2_ref), rtol=1e-5, atol=1e-5)

    print("KERNEL_OK")
</pallas_src>

<mosaic_0001>
module attributes {stable_mosaic.version = 11 : i64} {
  func.func @_attention_kernel(%arg0: memref<1xi32, #tpu.memory_space<smem>>, %arg1: memref<8x32xf32, #tpu.memory_space<vmem>>, %arg2: memref<16x32xf32, #tpu.memory_space<vmem>>, %arg3: memref<32x32xf32, #tpu.memory_space<vmem>>, %arg4: memref<32x32xf32, #tpu.memory_space<vmem>>, %arg5: memref<1x32xf32, #tpu.memory_space<vmem>>, %arg6: memref<8x32xf32, #tpu.memory_space<vmem>>, %arg7: memref<8x16xf32, #tpu.memory_space<vmem>>) attributes {dimension_semantics = [], scalar_prefetch = 0 : i64, scratch_operands = 0 : i64, tpu.core_type = #tpu.core_type<tc>} {
    %c0 = arith.constant 0 : index
    %c0_0 = arith.constant 0 : index
    %0 = vector.load %arg1[%c0, %c0_0] : memref<8x32xf32, #tpu.memory_space<vmem>>, vector<8x32xf32>
    %c0_1 = arith.constant 0 : index
    %c0_2 = arith.constant 0 : index
    %1 = vector.load %arg2[%c0_1, %c0_2] : memref<16x32xf32, #tpu.memory_space<vmem>>, vector<16x32xf32>
    %cst = arith.constant dense<0.000000e+00> : vector<8x16xf32>
    %2 = tpu.matmul %0, %1, %cst {dimension_numbers = #tpu.dot_dimension_numbers<[1], [1], [0], [0], [0, 0, 1, 0], [], []>} : vector<8x32xf32>, vector<16x32xf32>, vector<8x16xf32> -> vector<8x16xf32>
    %c0_3 = arith.constant 0 : index
    %3 = memref.load %arg0[%c0_3] : memref<1xi32, #tpu.memory_space<smem>>
    %4 = tpu.iota {dimensions = array<i32: 1>} : vector<8x16xi32>
    %5 = vector.broadcast %3 : i32 to vector<8x16xi32>
    %6 = arith.cmpi slt, %4, %5 : vector<8x16xi32>
    %cst_4 = arith.constant 0xFF800000 : f32
    %7 = vector.broadcast %cst_4 : f32 to vector<8x16xf32>
    %8 = arith.select %6, %2, %7 : vector<8x16xi1>, vector<8x16xf32>
    %cst_5 = arith.constant dense<0xFF800000> : vector<8xf32>
    %9 = vector.multi_reduction <maximumf>, %8, %cst_5 [1] : vector<8x16xf32> to vector<8xf32>
    %10 = vector.shape_cast %9 : vector<8xf32> to vector<8x1xf32>
    %11 = vector.broadcast %10 : vector<8x1xf32> to vector<8x16xf32>
    %12 = arith.subf %2, %11 : vector<8x16xf32>
    %13 = math.exp %12 : vector<8x16xf32>
    %cst_6 = arith.constant 0.000000e+00 : f32
    %14 = vector.broadcast %cst_6 : f32 to vector<8x16xf32>
    %15 = arith.select %6, %13, %14 : vector<8x16xi1>, vector<8x16xf32>
    %cst_7 = arith.constant dense<0.000000e+00> : vector<8xf32>
    %16 = vector.multi_reduction <add>, %15, %cst_7 [1] : vector<8x16xf32> to vector<8xf32>
    %17 = vector.shape_cast %16 : vector<8xf32> to vector<8x1xf32>
    %18 = tpu.reciprocal %17 {approx = true} : vector<8x1xf32> -> vector<8x1xf32>
    %19 = arith.mulf %17, %18 : vector<8x1xf32>
    %cst_8 = arith.constant 2.000000e+00 : f32
    %20 = vector.broadcast %cst_8 : f32 to vector<8x1xf32>
    %21 = arith.subf %20, %19 : vector<8x1xf32>
    %22 = arith.mulf %18, %21 : vector<8x1xf32>
    %23 = vector.broadcast %22 : vector<8x1xf32> to vector<8x16xf32>
    %24 = arith.mulf %15, %23 : vector<8x16xf32>
    %c0_9 = arith.constant 0 : index
    %c0_10 = arith.constant 0 : index
    %25 = vector.load %arg7[%c0_9, %c0_10] : memref<8x16xf32, #tpu.memory_space<vmem>>, vector<8x16xf32>
    tpu.vector_store %arg7[%c0_9, %c0_10], %24 {strides = array<i32>} : memref<8x16xf32, #tpu.memory_space<vmem>>, vector<8x16xf32>,
    %cst_11 = arith.constant dense<0.000000e+00> : vector<8x32xf32>
    %26 = tpu.matmul %24, %1, %cst_11 {dimension_numbers = #tpu.dot_dimension_numbers<[1], [0], [0], [1], [0, 0, 1, 1], [], []>} : vector<8x16xf32>, vector<16x32xf32>, vector<8x32xf32> -> vector<8x32xf32>
    %c0_12 = arith.constant 0 : index
    %c0_13 = arith.constant 0 : index
    %27 = vector.load %arg3[%c0_12, %c0_13] : memref<32x32xf32, #tpu.memory_space<vmem>>, vector<32x32xf32>
    %cst_14 = arith.constant dense<0.000000e+00> : vector<8x32xf32>
    %28 = tpu.matmul %26, %27, %cst_14 {dimension_numbers = #tpu.dot_dimension_numbers<[1], [0], [0], [1], [0, 0, 1, 1], [], []>} : vector<8x32xf32>, vector<32x32xf32>, vector<8x32xf32> -> vector<8x32xf32>
    %c0_15 = arith.constant 0 : index
    %c0_16 = arith.constant 0 : index
    %29 = vector.load %arg4[%c0_15, %c0_16] : memref<32x32xf32, #tpu.memory_space<vmem>>, vector<32x32xf32>
    %cst_17 = arith.constant dense<0.000000e+00> : vector<8x32xf32>
    %30 = tpu.matmul %0, %29, %cst_17 {dimension_numbers = #tpu.dot_dimension_numbers<[1], [0], [0], [1], [0, 0, 1, 1], [], []>} : vector<8x32xf32>, vector<32x32xf32>, vector<8x32xf32> -> vector<8x32xf32>
    %31 = arith.addf %28, %30 : vector<8x32xf32>
    %c0_18 = arith.constant 0 : index
    %c0_19 = arith.constant 0 : index
    %32 = vector.load %arg5[%c0_18, %c0_19] : memref<1x32xf32, #tpu.memory_space<vmem>>, vector<1x32xf32>
    %33 = vector.broadcast %32 : vector<1x32xf32> to vector<8x32xf32>
    %34 = arith.addf %31, %33 : vector<8x32xf32>
    %35 = math.tanh %34 : vector<8x32xf32>
    %c0_20 = arith.constant 0 : index
    %c0_21 = arith.constant 0 : index
    %36 = vector.load %arg6[%c0_20, %c0_21] : memref<8x32xf32, #tpu.memory_space<vmem>>, vector<8x32xf32>
    tpu.vector_store %arg6[%c0_20, %c0_21], %35 {strides = array<i32>} : memref<8x32xf32, #tpu.memory_space<vmem>>, vector<8x32xf32>,
    return
  }
}

</mosaic_0001>

<bundles_post_ra>
// kernel: attention_forward.1
= control target key start
LH: loop header
LB: loop body
LE: loop exit
PB: predicated region body
PF: predicated region fallthrough
CT: control target
= control target key end

     0   :  { %14 = vsyncpa [#allocation4], 0  ;;  %s518_s0 = inlined_call_operand.<no memory space> [shape: s32[1], index: 0, kind: input, shape index: {}]   ;;  %s519_s1 = inlined_call_operand.hbm [shape: f32[8,32], index: 1, kind: input, shape index: {}]   ;;  %s520_s2 = inlined_call_operand.hbm [shape: f32[16,32], index: 2, kind: input, shape index: {}]   ;;  %s521_s3 = inlined_call_operand.hbm [shape: f32[32,32], index: 3, kind: input, shape index: {}]   ;;  %s522_s4 = inlined_call_operand.hbm [shape: f32[32,32], index: 4, kind: input, shape index: {}]   ;;  %s523_s5 = inlined_call_operand.vmem [shape: f32[1,32], index: 5, kind: input, shape index: {}]   ;;  %s524_s6 = inlined_call_operand.hbm [shape: f32[8,32], index: 6, kind: output, shape index: {0}]   ;;  %s525_s7 = inlined_call_operand.hbm [shape: f32[8,16], index: 7, kind: output, shape index: {1}]  }
   0x1   :  { %15 = vsyncpa [#allocation7], 0 }
   0x2   :  { %16 = vsyncpa [#allocation10], 0 }
   0x3   :  { %17 = vsyncpa [#allocation5], 0  ;;  %s36_s26 = sshll.u32 %s520_s2, 4  ;;  %s37_s26 = int_to_ptr.hbm [resolvable:$true] %s36_s26 }
   0x4   :  { %18 = vsyncpa [#allocation13], 0  ;;  %s436_s27 = smov [#allocation6]   ;;  %s26_s8 = sshll.u32 %s519_s1, 4  ;;  %s27_s8 = int_to_ptr.hbm [resolvable:$true] %s26_s8 }
   0x5   :  { %s38_s28 = sshll.u32 %s436_s27, 4  ;;  %s437_s9 = smov 128   ;;  %s39_s28 = int_to_ptr.vmem [resolvable:$true] %s38_s28 }
   0x6   :  { %s438_s10 = smov 8   ;;  %s439_s11 = smov [#allocation3]  }
   0x7   :  { %44 = dma.hbm_to_vmem [thread:$0]  %s37_s26, 256, %s39_s28, [#allocation7], %s437_s9, %s437_s9, %s438_s10  }
   0x8   :  { %s28_s12 = sshll.u32 %s439_s11, 4  ;;  %s49_s15 = sshll.u32 %s521_s3, 4  ;;  %s29_s12 = int_to_ptr.vmem [resolvable:$true] %s28_s12  ;;  %s50_s15 = int_to_ptr.hbm [resolvable:$true] %s49_s15 }
   0x9   :  { %31 = dma.hbm_to_vmem [thread:$0]  %s27_s8, 128, %s29_s12, [#allocation4]  }
   0xa   :  { %s62_s17 = sshll.u32 %s522_s4, 4  ;;  %s440_s18 = smov [#allocation8]   ;;  %s63_s17 = int_to_ptr.hbm [resolvable:$true] %s62_s17 }
   0xb   :  { %s51_s19 = sshll.u32 %s440_s18, 4  ;;  %s441_s1 = smov [#allocation9]   ;;  %s52_s19 = int_to_ptr.vmem [resolvable:$true] %s51_s19 }
   0xc   :  { %57 = dma.hbm_to_vmem [thread:$0]  %s50_s15, 512, %s52_s19, [#allocation7], %s437_s9, %s437_s9, %s438_s10  }
   0xd   :  { %s64_s20 = sshll.u32 %s441_s1, 4  ;;  %s65_s20 = int_to_ptr.vmem [resolvable:$true] %s64_s20 }
   0xe   :  { %70 = dma.hbm_to_vmem [thread:$0]  %s63_s17, 512, %s65_s20, [#allocation10], %s437_s9, %s437_s9, %s438_s10  }
   0xf   :  { %426 = dma.done.wait [#allocation4], 128  }
  0x10   :  { %427 = vsyncadd [#allocation4], 4294967168 }
  0x11   :  { %428 = dma.done.wait [#allocation7], 768  }
  0x12   :  { %429 = vsyncadd [#allocation7], 4294966528 }
  0x13   :  { %430 = dma.done.wait [#allocation10], 512  }
  0x14   :  { %431 = vsyncadd [#allocation10], 4294966784  ;;  %vm92_vm0 = vcmask 261120   ;;  %v91_v0 = vld [vmem:[#allocation6 + $0x8] sm:$0xff]  ;;  %v90_v1 = vld [vmem:[#allocation6] sm:$0xff]  ;;  %v123_v3 = vlaneseq  ;;  %v125_v5 = vstv %s518_s0  ;;  %vm128_vm2 = vcmask 130048  }
  0x15   :  { %261 = vmatpush.xpose.msk.msra.mxu0 %vm92_vm0, %v91_v0  ;;  %162 = vmatpush.msra.mxu1 %v91_v0  ;;  %v89_v2 = vld [vmem:[#allocation3] sm:$0xff]  ;;  %v175_v15 = vld [vmem:[#allocation9 + $0x18] sm:$0xff]  ;;  %v174_v17 = vld [vmem:[#allocation9 + $0x10] sm:$0xff]  ;;  %s442_s0 = smov [#allocation12]   ;;  %s244_s24 = sshll.u32 %s525_s7, 4  ;;  %s245_s24 = int_to_ptr.hbm [resolvable:$true] %s244_s24 }
  0x16   :  { %v124_v4 = vand.u32 127, %v123_v3  ;;  %v171_v16 = vld [vmem:[#allocation8 + $0x18] sm:$0xff]  ;;  %188 = vmatpush.msra.mxu2 %v175_v15  ;;  %v170_v18 = vld [vmem:[#allocation8 + $0x10] sm:$0xff]  ;;  %v173_v19 = vld [vmem:[#allocation9 + $0x8] sm:$0xff]  ;;  %s242_s21 = sshll.u32 %s442_s0, 4  ;;  %s443_s27 = smov [#allocation11]   ;;  %s243_s21 = int_to_ptr.vmem [resolvable:$true] %s242_s21 }
  0x17   :  { %163 = vmatpush.msra.mxu1 %v90_v1  ;;  %211 = vmatpush.msra.mxu3 %v171_v16  ;;  %v169_v20 = vld [vmem:[#allocation8 + $0x8] sm:$0xff]  ;;  %v172_v27 = vld [vmem:[#allocation9] sm:$0xff]  ;;  %s231_s28 = sshll.u32 %s443_s27, 4  ;;  %s233_s8 = sshll.u32 %s524_s6, 4  ;;  %s232_s28 = int_to_ptr.vmem [resolvable:$true] %s231_s28  ;;  %s234_s8 = int_to_ptr.hbm [resolvable:$true] %s233_s8 }
  0x18   :  { %vm126_vm1 = vcmp.lt.s32.totalorder %v124_v4, %v125_v5  ;;  %189 = vmatpush.msra.mxu2 %v174_v17  ;;  %v168_v28 = vld [vmem:[#allocation8] sm:$0xff]  ;;  %v275_v31 = vld [vmem:[%s523_s5] ss:$0 sm:$0xff] }
  0x19   :  { %262 = vmatpush.xpose.msk.msra.mxu0 %vm92_vm0, %v90_v1  ;;  %212 = vmatpush.msra.mxu3 %v170_v18 }
  0x1a   :  { %190 = vmatpush.msra.mxu2 %v173_v19 }
  0x1b   :  { %213 = vmatpush.msra.mxu3 %v169_v20 }
  0x1c   :  { %263 = vmatmul.msk.f32.vlgmr.msra.gmra.mxu0 %vm92_vm0, %v89_v2  ;;  %191 = vmatpush.msra.mxu2 %v172_v27 }
  0x1d   :  { %214 = vmatpush.msra.mxu3 %v168_v28  ;;  %265 = vmatmul.msk.f32.vlgmr.msra.gmra.mxu2 %vm92_vm0, %v89_v2 }
  0x99   :  { %v119_v6 = vpop.f32.mrf.mxu0 }
  0x9a   :  { %v127_v7 = vsel %vm126_vm1, %v119_v6, -inf }
  0x9b   :  { %v129_v8 = vsel %vm128_vm2, %v127_v7, -inf }
  0x9c   :  { %130 = vmax.xlane.f32.xlu0 %v129_v8 }
  0xa0   :  { %v193_v30 = vpop.f32.mrf.mxu2 }
 0x10f   :  { %v131_v9 = vpop.xlane.xlu0 %130 }
 0x110   :  { %v132_v10 = vsub.f32 %v119_v6, %v131_v9 }
 0x112   :  { %v133_v11 = vmul.f32 1.442695, %v132_v10 }
 0x114   :  { %276 = vpow2.f32 %v133_v11 }
 0x11a   :  { %v277_v12 = vpop.eup %276 }
 0x11b   :  { %v135_v13 = vsel %vm126_vm1, %v277_v12, 0.0 }
 0x11c   :  { %v136_v14 = vsel %vm128_vm2, %v135_v13, 0.0 }
 0x11d   :  { %137 = vadd.xlane.f32.xlu0 %v136_v14 }
 0x190   :  { %v138_v21 = vpop.xlane.xlu0 %137 }
 0x191   :  { %278 = vrcp.f32 %v138_v21 }
 0x197   :  { %v279_v22 = vpop.eup %278 }
 0x198   :  { %v140_v23 = vmul.f32 %v279_v22, %v138_v21 }
 0x19a   :  { %v141_v24 = vsub.f32 2.0, %v140_v23 }
 0x19c   :  { %v142_v25 = vmul.f32 %v279_v22, %v141_v24 }
 0x19e   :  { %v143_v26 = vmul.f32 %v142_v25, %v135_v13 }
 0x1a0   :  { %264 = vmatmul.msk.f32.vlgmr.msra.gmra.mxu1 %vm128_vm2, %v143_v26  ;;  %144 = vst.msk [vmem:[#allocation12] sm:$0xff] %vm128_vm2, %v143_v26 }
 0x1a1   :  { %247 = dma.vmem_to_hbm [thread:$0]  %s243_s21, 128, %s245_s24, [#allocation13]  }
 0x21d   :  { %v165_v29 = vpop.f32.mrf.mxu1 }
 0x21e   :  { %266 = vmatmul.msk.f32.vlgmr.msra.gmra.mxu3 %vm92_vm0, %v165_v29 }
 0x2a1   :  { %v216_v32 = vpop.f32.mrf.mxu3 }
 0x2a2   :  { %v217_v33 = vadd.f32 %v216_v32, %v193_v30 }
 0x2a4   :  { %v223_v34 = vadd.f32 %v275_v31, %v217_v33 }
 0x2a6   :  { %280 = vtanh.f32 %v223_v34 }
 0x2ac   :  { %v281_v35 = vpop.eup %280 }
 0x2ad   :  { %225 = vst.msk [vmem:[#allocation11] sm:$0xff] %vm92_vm0, %v281_v35 }
 0x2ae   :  { %236 = dma.vmem_to_hbm [thread:$0]  %s232_s28, 128, %s234_s8, [#allocation5]  }
 0x2af   :  { %432 = dma.done.wait [#allocation5], 128  }
 0x2b0   :  { %433 = vsyncadd [#allocation5], 4294967168 }
 0x2b1   :  { %434 = dma.done.wait [#allocation13], 128  }
 0x2b2   :  { %435 = vsyncadd [#allocation13], 4294967168 }
 0x2b3   :  { %256 = vsyncpa [#allocation4], 1 }
 0x2b4   :  { %257 = vsyncpa [#allocation7], 1 }
 0x2b5   :  { %258 = vsyncpa [#allocation10], 1 }
 0x2b6   :  { %259 = vsyncpa [#allocation5], 1 }
 0x2b7   :  { %260 = vsyncpa [#allocation13], 1 }

</bundles_post_ra>
